<compile_context>
chip_gen: v7x
topology: tpu7x:2x2x1
jax: 0.10.0
libtpu: 0.0.40
codegen_flags: <defaults>
</compile_context>

<pallas_src>
import jax
import jax.numpy as jnp
from jax import lax
from jax.experimental import pallas as pl
from jax.experimental.pallas import tpu as pltpu


def _embing_kernel(x_ref, band_ref, out_ref):
    # x_ref:    (nb, H+2, W*C)        bf16, H-halo padded, (W, C) packed on lanes
    # band_ref: (3*W*C, W*2*Cout)     bf16, banded weights (conv_a | conv_b fused on Cout)
    # out_ref:  (nb, H, W*2*Cout)     lane-dense packed output (f32 or input dtype)
    nb, _, wc = x_ref.shape
    h = out_ref.shape[1]
    wcc = out_ref.shape[2]

    x = x_ref[...]                                             # single bf16 load
    # K-concat the three H-shifted views once; the 3 W-direction taps (incl. the W halo)
    # already live inside the banded weight, so this is the only relayout in the kernel.
    xs = jnp.concatenate(
        [x[:, 0:h, :], x[:, 1:h + 1, :], x[:, 2:h + 2, :]], axis=-1
    ).reshape(nb * h, 3 * wc)                                  # (M, 3*W*C)

    # One MXU matmul, f32 accumulation.
    acc = jnp.dot(xs, band_ref[...], preferred_element_type=jnp.float32)
    out_ref[...] = acc.reshape(nb, h, wcc).astype(out_ref.dtype)


def _banded_weights(w_a_oihw, w_b_oihw, W):
    """Fuse both conv weights along Cout and fold the 3 W-direction taps (incl. the W
    halo / zero padding) into a banded (3*W*C, W*2*Cout) matrix; the leading factor of
    3 is the kernel-row (kh) axis, matching the kernel's K-concat of H-shifted slices."""
    wa = jnp.transpose(w_a_oihw, (2, 3, 1, 0))             # (3, 3, Cin, Cout)
    wb = jnp.transpose(w_b_oihw, (2, 3, 1, 0))
    wf = jnp.concatenate([wa, wb], axis=-1)                 # (3, 3, Cin, 2*Cout)
    C = wf.shape[2]
    Co2 = wf.shape[3]

    # band[kh, w_src*C + ci, w_dst*2Co + co] = wf[kh, w_src - w_dst + 1, ci, co]
    # for |w_src - w_dst| <= 1, else 0 (out-of-image taps absent == zero padding in W).
    kw_idx = jnp.arange(W)[:, None] - jnp.arange(W)[None, :] + 1   # (w_src, w_dst)
    valid = (kw_idx >= 0) & (kw_idx <= 2)
    band = wf[:, jnp.clip(kw_idx, 0, 2)]                    # (3, W, W, C, 2Co)
    band = jnp.where(valid[None, :, :, None, None], band, 0.0)
    band = band.transpose(0, 1, 3, 2, 4).reshape(3 * W * C, W * Co2)
    return band.astype(jnp.bfloat16)                        # MXU-native operands


def embing_block(fea_nchw, w_a_oihw, w_b_oihw, *, batch_block=None):
    """Forward of EmbingBlock. fea_nchw: (N, C, H, W); weights: (Cout, Cin, 3, 3)."""
    N, C, H, W = fea_nchw.shape
    Co = w_a_oihw.shape[0]
    dt = fea_nchw.dtype

    # Scaling guard: the banded trick inflates weight VMEM as O(W^2) and MACs by ~W/3.
    # Fine (and overhead-hidden) at small W; revisit with a shifted-slice im2col beyond.
    band_bytes = (3 * W * C) * (W * 2 * Co) * 2
    assert band_bytes <= 8 * 1024 * 1024, (
        "banded-weight path not sized for this W; use an im2col fallback")
    # TODO(synk): add a K=9*C shifted-slice im2col fallback for large W instead of asserting.

    band = _banded_weights(w_a_oihw, w_b_oihw, W)           # (3*W*C, W*2*Co) bf16

    # NCHW -> (N, H+2, W*C) in bf16 (cast fused with the repack -> half the input DMA).
    # Only the H halo is materialized; the W halo lives inside `band`.
    x = jnp.transpose(fea_nchw, (0, 2, 3, 1)).reshape(N, H, W * C).astype(jnp.bfloat16)
    x = jnp.pad(x, ((0, 0), (1, 1), (0, 0)))
    Hp = H + 2

    # Batch tiling: target ~1024 matmul rows per grid step (amortize per-step overhead,
    # fill the MXU), but guarantee >= 2 grid steps when N >= 2 so the "parallel" axis can
    # spread across v7x's two TensorCores. Per-block VMEM stays tiny (~25 KiB/batch).
    if batch_block is None:
        batch_block = max(1, min(N, 1024 // max(H, 1)))
        if N >= 2:
            batch_block = min(batch_block, max(1, N // 2))
    nb = batch_block
    n_steps = pl.cdiv(N, nb)
    Npad = n_steps * nb
    if Npad != N:
        # Ragged batch: pad with zero batches (independent along N) and slice the result.
        x = jnp.pad(x, ((0, Npad - N), (0, 0), (0, 0)))

    out = pl.pallas_call(
        _embing_kernel,
        out_shape=jax.ShapeDtypeStruct((Npad, H, W * 2 * Co), dt),
        grid=(n_steps,),
        in_specs=[
            pl.BlockSpec((nb, Hp, W * C), lambda i: (i, 0, 0)),
            pl.BlockSpec((3 * W * C, W * 2 * Co), lambda i: (0, 0)),
        ],
        out_specs=pl.BlockSpec((nb, H, W * 2 * Co), lambda i: (i, 0, 0)),
        compiler_params=pltpu.CompilerParams(
            dimension_semantics=("parallel",)),
    )(x, band)

    if Npad != N:
        out = out[:N]

    # (N, H, W*2*Co) -> split conv_a / conv_b and return NCHW, matching PyTorch.
    out = out.reshape(N, H, W, 2, Co)
    out = jnp.transpose(out, (3, 0, 4, 1, 2))               # (2, N, Co, H, W)
    return out[0], out[1]


def _reference(fea_nchw, w_a_oihw, w_b_oihw):
    dn = lax.conv_dimension_numbers(fea_nchw.shape, w_a_oihw.shape,
                                    ("NCHW", "OIHW", "NCHW"))
    conv = lambda w: lax.conv_general_dilated(
        fea_nchw, w, window_strides=(1, 1), padding=((1, 1), (1, 1)),
        dimension_numbers=dn, precision=lax.Precision.HIGHEST)
    return conv(w_a_oihw), conv(w_b_oihw)


if __name__ == "__main__":
    key = jax.random.PRNGKey(0)
    k_x, k_wa, k_wb = jax.random.split(key, 3)

    N, C, H, W = 2, 8, 16, 16  # inplanes = 8
    fea = jax.random.normal(k_x, (N, C, H, W), dtype=jnp.float32)

    # Deterministic init mirroring m.weight.data.normal_(std=0.01), bias=False.
    w_a = 0.01 * jax.random.normal(k_wa, (C, C, 3, 3), dtype=jnp.float32)
    w_b = 0.01 * jax.random.normal(k_wb, (C, C, 3, 3), dtype=jnp.float32)

    fea_a, fea_b = jax.jit(embing_block)(fea, w_a, w_b)
    jax.block_until_ready((fea_a, fea_b))

    ref_a, ref_b = _reference(fea, w_a, w_b)
    assert fea_a.shape == (N, C, H, W) and fea_b.shape == (N, C, H, W)
    # bf16 MXU operands with f32 accumulation -> slightly looser tolerance than pure f32.
    assert jnp.allclose(fea_a, ref_a, atol=5e-3, rtol=5e-2)
    assert jnp.allclose(fea_b, ref_b, atol=5e-3, rtol=5e-2)

    print("KERNEL_OK")
</pallas_src>

<mosaic_0001>
module attributes {stable_mosaic.version = 11 : i64} {
  func.func @_embing_kernel(%arg0: i32, %arg1: memref<1x18x128xbf16, #tpu.memory_space<vmem>>, %arg2: memref<384x256xbf16, #tpu.memory_space<vmem>>, %arg3: memref<1x16x256xf32, #tpu.memory_space<vmem>>) attributes {dimension_semantics = [#tpu.dimension_semantics<parallel>], iteration_bounds = array<i64: 2>, scalar_prefetch = 0 : i64, scratch_operands = 0 : i64, tpu.core_type = #tpu.core_type<tc>, window_params = [{transform_indices = @transform_0, window_bounds = array<i64: 1, 18, 128>}, {pipeline_mode = #tpu.pipeline_mode<synchronous>, transform_indices = @transform_1, window_bounds = array<i64: 384, 256>}, {transform_indices = @transform_2, window_bounds = array<i64: 1, 16, 256>}]} {
    %c0 = arith.constant 0 : index
    %c0_0 = arith.constant 0 : index
    %c0_1 = arith.constant 0 : index
    %0 = vector.load %arg1[%c0, %c0_0, %c0_1] : memref<1x18x128xbf16, #tpu.memory_space<vmem>>, vector<1x18x128xbf16>
    %1 = vector.extract_strided_slice %0 {offsets = [0, 0, 0], sizes = [1, 16, 128], strides = [1, 1, 1]} : vector<1x18x128xbf16> to vector<1x16x128xbf16>
    %2 = vector.extract_strided_slice %0 {offsets = [0, 1, 0], sizes = [1, 16, 128], strides = [1, 1, 1]} : vector<1x18x128xbf16> to vector<1x16x128xbf16>
    %3 = vector.extract_strided_slice %0 {offsets = [0, 2, 0], sizes = [1, 16, 128], strides = [1, 1, 1]} : vector<1x18x128xbf16> to vector<1x16x128xbf16>
    %4 = tpu.concatenate %1, %2, %3 in 2 : vector<1x16x128xbf16>, vector<1x16x128xbf16>, vector<1x16x128xbf16> -> vector<1x16x384xbf16>
    %5 = vector.shape_cast %4 : vector<1x16x384xbf16> to vector<16x384xbf16>
    %c0_2 = arith.constant 0 : index
    %c0_3 = arith.constant 0 : index
    %6 = vector.load %arg2[%c0_2, %c0_3] : memref<384x256xbf16, #tpu.memory_space<vmem>>, vector<384x256xbf16>
    %cst = arith.constant dense<0.000000e+00> : vector<16x256xf32>
    %7 = tpu.matmul %5, %6, %cst {dimension_numbers = #tpu.dot_dimension_numbers<[1], [0], [0], [1], [0, 0, 1, 1], [], []>} : vector<16x384xbf16>, vector<384x256xbf16>, vector<16x256xf32> -> vector<16x256xf32>
    %8 = vector.shape_cast %7 : vector<16x256xf32> to vector<1x16x256xf32>
    %c0_4 = arith.constant 0 : index
    %c0_5 = arith.constant 0 : index
    %c0_6 = arith.constant 0 : index
    %9 = vector.load %arg3[%c0_4, %c0_5, %c0_6] : memref<1x16x256xf32, #tpu.memory_space<vmem>>, vector<1x16x256xf32>
    tpu.vector_store %arg3[%c0_4, %c0_5, %c0_6], %8 {strides = array<i32>} : memref<1x16x256xf32, #tpu.memory_space<vmem>>, vector<1x16x256xf32>,
    return
  }
  func.func @transform_0(%arg0: i32) -> (i32, i32, i32) {
    %c0_i32 = arith.constant 0 : i32
    %c0_i32_0 = arith.constant 0 : i32
    %c0_i32_1 = arith.constant 0 : i32
    return %arg0, %c0_i32, %c0_i32_0 : i32, i32, i32
  }
  func.func @transform_1(%arg0: i32) -> (i32, i32) {
    %c0_i32 = arith.constant 0 : i32
    %c0_i32_0 = arith.constant 0 : i32
    %c0_i32_1 = arith.constant 0 : i32
    return %c0_i32, %c0_i32_0 : i32, i32
  }
  func.func @transform_2(%arg0: i32) -> (i32, i32, i32) {
    %c0_i32 = arith.constant 0 : i32
    %c0_i32_0 = arith.constant 0 : i32
    %c0_i32_1 = arith.constant 0 : i32
    return %arg0, %c0_i32, %c0_i32_0 : i32, i32, i32
  }
}

</mosaic_0001>

<bundles_post_ra>
// kernel: embing_block.1
= control target key start
LH: loop header
LB: loop body
LE: loop exit
PB: predicated region body
PF: predicated region fallthrough
CT: control target
= control target key end

     0   :  { %s782_s9 = smov 0   ;;  %s951_s0 = inlined_call_operand.vmem [shape: bf16[2,18,128], index: 0, kind: input, shape index: {}]   ;;  %s952_s1 = inlined_call_operand.vmem [shape: bf16[384,256], index: 1, kind: input, shape index: {}]   ;;  %s953_s2 = inlined_call_operand.vmem [shape: f32[2,16,256], index: 2, kind: output, shape index: {}]  }
   0x1 LB: > { %s609_s10 = sadd.s32 4294967295, %s764_s9   ;;  %p613_p0 = scmp.ge.s32.totalorder %s764_s9, 1  ;;  %s764_s9 = sphi %s782_s9, %s12_s9  }
   0x2   : > { %p112_p1 = scmp.lt.s32.totalorder %s764_s9, 3 }
   0x4   : > { %p113_p2 = pnand %p613_p0, %p112_p1 }
   0x5   : > { %v684_v0 = vld [vmem:[%s952_s1 + $0x4] ss:$8 sps:$4 sm:$0xff] (!%p113_p2)   ;;  %v686_v1 = vld [vmem:[%s952_s1] ss:$8 sps:$4 sm:$0xff] (!%p113_p2)   ;;  %v766_v2 = vmov (!%p113_p2), 0   ;;  %p134_p3 = scmp.lt.s32.totalorder (!%p113_p2), %s609_s10, 1 }
   0x6   : > { %116 = sbr.rel (%p113_p2) target bundleno = 288 (0x120), region = 28  ;;  %539 = vmatprep.mubr.bf16.mxu0 (!%p113_p2), %v766_v2  ;;  %464 = vmatprep.subr.bf16.mxu1 (!%p113_p2), %v684_v0  ;;  %v687_v3 = vld [vmem:[%s952_s1 + $0x14] ss:$8 sps:$4 sm:$0xff] (!%p113_p2)   ;;  %v689_v4 = vld [vmem:[%s952_s1 + $0x10] ss:$8 sps:$4 sm:$0xff] (!%p113_p2)   ;;  %vm171_vm1 = vcmask (!%p113_p2), 1046528  }
   0x7   : > { %465 = vmatpush1.bf16.msra.mxu1 (!%p113_p2), %v686_v1  ;;  %v690_v5 = vld [vmem:[%s952_s1 + $0x24] ss:$8 sps:$4 sm:$0xff] (!%p113_p2)   ;;  %v692_v6 = vld [vmem:[%s952_s1 + $0x20] ss:$8 sps:$4 sm:$0xff] (!%p113_p2)   ;;  %v693_v7 = vld [vmem:[%s952_s1 + $0x34] ss:$8 sps:$4 sm:$0xff] (!%p113_p2)  }
   0x8   : > { %466 = vmatprep.subr.bf16.mxu1 (!%p113_p2), %v687_v3  ;;  %v695_v8 = vld [vmem:[%s952_s1 + $0x30] ss:$8 sps:$4 sm:$0xff] (!%p113_p2)   ;;  %v708_v9 = vld [vmem:[%s952_s1 + $0x104] ss:$8 sps:$4 sm:$0xff] (!%p113_p2)   ;;  %v710_v10 = vld [vmem:[%s952_s1 + $0x100] ss:$8 sps:$4 sm:$0xff] (!%p113_p2)  }
   0x9   : > { %v696_v11 = vld [vmem:[%s952_s1 + $0x44] ss:$8 sps:$4 sm:$0xff] (!%p113_p2)   ;;  %507 = vmatprep.subr.bf16.mxu0 (!%p113_p2), %v708_v9  ;;  %v714_v12 = vld [vmem:[%s952_s1 + $0x114] ss:$8 sps:$4 sm:$0xff] (!%p113_p2)   ;;  %v716_v13 = vld [vmem:[%s952_s1 + $0x110] ss:$8 sps:$4 sm:$0xff] (!%p113_p2)  }
   0xa   : > { %508 = vmatpush1.bf16.msra.mxu0 (!%p113_p2), %v710_v10  ;;  %v698_v14 = vld [vmem:[%s952_s1 + $0x40] ss:$8 sps:$4 sm:$0xff] (!%p113_p2)   ;;  %v699_v15 = vld [vmem:[%s952_s1 + $0x54] ss:$8 sps:$4 sm:$0xff] (!%p113_p2)   ;;  %v720_v16 = vld [vmem:[%s952_s1 + $0x124] ss:$8 sps:$4 sm:$0xff] (!%p113_p2)  }
   0xb   : > { %467 = vmatpush1.bf16.msra.mxu1 (!%p113_p2), %v689_v4  ;;  %509 = vmatprep.subr.bf16.mxu0 (!%p113_p2), %v714_v12  ;;  %v722_v17 = vld [vmem:[%s952_s1 + $0x120] ss:$8 sps:$4 sm:$0xff] (!%p113_p2)   ;;  %v701_v18 = vld [vmem:[%s952_s1 + $0x50] ss:$8 sps:$4 sm:$0xff] (!%p113_p2)   ;;  %v726_v19 = vld [vmem:[%s952_s1 + $0x134] ss:$8 sps:$4 sm:$0xff] (!%p113_p2)  }
   0xc   : > { %468 = vmatprep.subr.bf16.mxu1 (!%p113_p2), %v690_v5  ;;  %v702_v20 = vld [vmem:[%s952_s1 + $0x64] ss:$8 sps:$4 sm:$0xff] (!%p113_p2)   ;;  %v728_v21 = vld [vmem:[%s952_s1 + $0x130] ss:$8 sps:$4 sm:$0xff] (!%p113_p2)   ;;  %v704_v22 = vld [vmem:[%s952_s1 + $0x60] ss:$8 sps:$4 sm:$0xff] (!%p113_p2)  }
   0xd   : > { %s955_s10 = smov (!%p134_p3, %s609_s10), 1  ;;  %v732_v23 = vld [vmem:[%s952_s1 + $0x144] ss:$8 sps:$4 sm:$0xff]   ;;  %v705_v24 = vld [vmem:[%s952_s1 + $0x74] ss:$8 sps:$4 sm:$0xff]  }
   0xe   : > { %510 = vmatpush1.bf16.msra.mxu0 %v716_v13  ;;  %v734_v25 = vld [vmem:[%s952_s1 + $0x140] ss:$8 sps:$4 sm:$0xff]   ;;  %s674_s7 = smul.u32 12, %s955_s10  ;;  %v707_v26 = vld [vmem:[%s952_s1 + $0x70] ss:$8 sps:$4 sm:$0xff]   ;;  %s669_s5 = sshll.u32 %s955_s10, 5 }
   0xf   : > { %469 = vmatpush1.bf16.msra.mxu1 %v692_v6  ;;  %511 = vmatprep.subr.bf16.mxu0 %v720_v16  ;;  %v738_v27 = vld [vmem:[%s952_s1 + $0x154] ss:$8 sps:$4 sm:$0xff]   ;;  %v711_v28 = vld [vmem:[%s952_s1 + $0x84] ss:$8 sps:$4 sm:$0xff]   ;;  %v713_v29 = vld [vmem:[%s952_s1 + $0x80] ss:$8 sps:$4 sm:$0xff]   ;;  %s143_s8 = scalar_lea.vmem %s953_s2, %s669_s5 }
  0x10   : > { %470 = vmatprep.subr.bf16.mxu1 %v693_v7  ;;  %v740_v30 = vld [vmem:[%s952_s1 + $0x150] ss:$8 sps:$4 sm:$0xff]   ;;  %s138_s22 = scalar_lea.vmem %s951_s0, %s674_s7  ;;  %v717_v31 = vld [vmem:[%s952_s1 + $0x94] ss:$8 sps:$4 sm:$0xff]   ;;  %v744_v32 = vld [vmem:[%s952_s1 + $0x164] ss:$8 sps:$4 sm:$0xff]  }
  0x11   : > { %v756_v33 = vld [vmem:[%s138_s22] sm:$0xff]   ;;  %v757_v34 = vld [vmem:[%s138_s22 + $0x8] ss:$0 sps:$4 sm:$0x11]   ;;  %v719_v36 = vld [vmem:[%s952_s1 + $0x90] ss:$8 sps:$4 sm:$0xff]  }
  0x12   : > { %512 = vmatpush1.bf16.msra.mxu0 %v722_v17  ;;  %v746_v35 = vld [vmem:[%s952_s1 + $0x160] ss:$8 sps:$4 sm:$0xff]   ;;  %v750_v37 = vld [vmem:[%s952_s1 + $0x174] ss:$8 sps:$4 sm:$0xff]   ;;  %v159_v38 = vshrl.u32 %v756_v33, 16  ;;  %v161_v39 = vshll.u32 %v756_v33, 16 }
  0x13   : > { %471 = vmatpush1.bf16.msra.mxu1 %v695_v8  ;;  %513 = vmatprep.subr.bf16.mxu0 %v726_v19  ;;  %v723_v40 = vld [vmem:[%s952_s1 + $0xa4] ss:$8 sps:$4 sm:$0xff]   ;;  %v166_v41 = vshll.u32 %v757_v34, 16  ;;  %vm157_vm0 = vsmask.f32 7424  ;;  %v172_v44 = vrot.slane %v756_v33, 1 }
  0x14   : > { %472 = vmatprep.subr.bf16.mxu1 %v696_v11  ;;  %v163_v42 = vrot.slane %v161_v39, 1  ;;  %v752_v43 = vld [vmem:[%s952_s1 + $0x170] ss:$8 sps:$4 sm:$0xff]   ;;  %v173_v45 = vrot.slane %v757_v34, 1  ;;  %v725_v47 = vld [vmem:[%s952_s1 + $0xa0] ss:$8 sps:$4 sm:$0xff]  }
  0x15   : > { %v168_v46 = vrot.slane %v166_v41, 1  ;;  %v729_v49 = vld [vmem:[%s952_s1 + $0xb4] ss:$8 sps:$4 sm:$0xff]   ;;  %v731_v52 = vld [vmem:[%s952_s1 + $0xb0] ss:$8 sps:$4 sm:$0xff]  }
  0x16   : > { %514 = vmatpush1.bf16.msra.mxu0 %v728_v21  ;;  %v164_v48 = vor.u32 %v163_v42, %v159_v38  ;;  %v174_v51 = vsel %vm171_vm1, %v172_v44, %v173_v45  ;;  %v735_v53 = vld [vmem:[%s952_s1 + $0xc4] ss:$8 sps:$4 sm:$0xff]   ;;  %v737_v54 = vld [vmem:[%s952_s1 + $0xc0] ss:$8 sps:$4 sm:$0xff]   ;;  %v741_v55 = vld [vmem:[%s952_s1 + $0xd4] ss:$8 sps:$4 sm:$0xff]  }
  0x17   : > { %473 = vmatpush1.bf16.msra.mxu1 %v698_v14  ;;  %515 = vmatprep.subr.bf16.mxu0 %v732_v23  ;;  %v743_v56 = vld [vmem:[%s952_s1 + $0xd0] ss:$8 sps:$4 sm:$0xff]   ;;  %v747_v57 = vld [vmem:[%s952_s1 + $0xe4] ss:$8 sps:$4 sm:$0xff]   ;;  %v749_v58 = vld [vmem:[%s952_s1 + $0xe0] ss:$8 sps:$4 sm:$0xff]  }
  0x18   : > { %474 = vmatprep.subr.bf16.mxu1 %v699_v15  ;;  %v169_v50 = vsel %vm157_vm0, %v164_v48, %v168_v46  ;;  %v753_v59 = vld [vmem:[%s952_s1 + $0xf4] ss:$8 sps:$4 sm:$0xff]   ;;  %v755_v60 = vld [vmem:[%s952_s1 + $0xf0] ss:$8 sps:$4 sm:$0xff]  }
  0x19   : > { %496 = vmatprep.mubr.bf16.mxu1 %v169_v50 }
  0x1a   : > { %516 = vmatpush1.bf16.msra.mxu0 %v734_v25 }
  0x1b   : > { %475 = vmatpush1.bf16.msra.mxu1 %v701_v18  ;;  %517 = vmatprep.subr.bf16.mxu0 %v738_v27 }
  0x1c   : > { %476 = vmatprep.subr.bf16.mxu1 %v702_v20 }
  0x1e   : > { %518 = vmatpush1.bf16.msra.mxu0 %v740_v30 }
  0x1f   : > { %477 = vmatpush1.bf16.msra.mxu1 %v704_v22  ;;  %519 = vmatprep.subr.bf16.mxu0 %v744_v32 }
  0x20   : > { %478 = vmatprep.subr.bf16.mxu1 %v705_v24 }
  0x22   : > { %520 = vmatpush1.bf16.msra.mxu0 %v746_v35 }
  0x23   : > { %479 = vmatpush1.bf16.msra.mxu1 %v707_v26  ;;  %521 = vmatprep.subr.bf16.mxu0 %v750_v37 }
  0x24   : > { %480 = vmatprep.subr.bf16.mxu1 %v711_v28 }
  0x26   : > { %522 = vmatpush1.bf16.msra.mxu0 %v752_v43 }
  0x27   : > { %481 = vmatpush1.bf16.msra.mxu1 %v713_v29 }
  0x28   : > { %482 = vmatprep.subr.bf16.mxu1 %v717_v31 }
  0x29   : > { %540 = vmatmul.mubr.bf16.vlgmr.msra.gmra.mrb[0].mxu0 %v174_v51 }
  0x2b   : > { %483 = vmatpush1.bf16.msra.mxu1 %v719_v36 }
  0x2c   : > { %484 = vmatprep.subr.bf16.mxu1 %v723_v40 }
  0x2f   : > { %485 = vmatpush1.bf16.msra.mxu1 %v725_v47 }
  0x30   : > { %486 = vmatprep.subr.bf16.mxu1 %v729_v49 }
  0x33   : > { %487 = vmatpush1.bf16.msra.mxu1 %v731_v52 }
  0x34   : > { %488 = vmatprep.subr.bf16.mxu1 %v735_v53 }
  0x37   : > { %489 = vmatpush1.bf16.msra.mxu1 %v737_v54 }
  0x38   : > { %490 = vmatprep.subr.bf16.mxu1 %v741_v55 }
  0x3b   : > { %491 = vmatpush1.bf16.msra.mxu1 %v743_v56 }
  0x3c   : > { %492 = vmatprep.subr.bf16.mxu1 %v747_v57 }
  0x3f   : > { %493 = vmatpush1.bf16.msra.mxu1 %v749_v58 }
  0x40   : > { %494 = vmatprep.subr.bf16.mxu1 %v753_v59 }
  0x43   : > { %495 = vmatpush1.bf16.msra.mxu1 %v755_v60 }
  0x46   : > { %497 = vmatmul.mubr.bf16.vlgmr.msra.gmra.mrb[0].mxu1 %v756_v33 }
  0xfc   : > { %v541_v61 = vpop.f32.mrb[0].mxu0 }
  0xfd   : > { %v543_v62 = vpop.f32.mrb[1].mxu0 }
  0xfe   : > { %v545_v63 = vpop.f32.mrb[2].mxu0 }
  0xff   : > { %v547_v0 = vpop.f32.mrb[3].mxu0 }
 0x119   : > { %v498_v1 = vpop.f32.mrb[0].mxu1 }
 0x11a   : > { %v542_v2 = vadd.f32 %v541_v61, %v498_v1  ;;  %v500_v3 = vpop.f32.mrb[1].mxu1 }
 0x11b   : > { %v544_v4 = vadd.f32 %v543_v62, %v500_v3  ;;  %v502_v5 = vpop.f32.mrb[2].mxu1 }
 0x11c   : > { %550 = vst [vmem:[%s143_s8] sm:$0xff] %v542_v2  ;;  %v546_v6 = vadd.f32 %v545_v63, %v502_v5  ;;  %v504_v7 = vpop.f32.mrb[3].mxu1 }
 0x11d   : > { %551 = vst [vmem:[%s143_s8 + $0x8] sm:$0xff] %v544_v4  ;;  %v548_v8 = vadd.f32 %v547_v0, %v504_v7 }
 0x11e   : > { %552 = vst [vmem:[%s143_s8 + $0x10] sm:$0xff] %v546_v6 }
 0x11f   : > { %553 = vst [vmem:[%s143_s8 + $0x18] sm:$0xff] %v548_v8 }
 0x120 PF: > { %s12_s9 = sadd.s32 1, %s764_s9  }
 0x121   : > { %p9_p4 = scmp.ge.s32.totalorder %s12_s9, 4  }
 0x123   :  { %11 = sbr.rel (!%p9_p4) target bundleno = 1 (0x1), region = 58 }

</bundles_post_ra>
